<compile_context>
chip_gen: v7x
topology: tpu7x:2x2x1
jax: 0.10.0
libtpu: 0.0.40
codegen_flags: <defaults>
</compile_context>

<pallas_src>
import jax
import jax.numpy as jnp
from jax.experimental import pallas as pl
from jax.experimental.pallas import tpu as pltpu

NUM_ACTION = 8  # env.num_action is env-defined; fixed deterministically here.


def dueling_net_kernel(x_ref, wa_ref, b1_ref, w2b_ref, b2_ref,
                       w34_ref, b34_ref, wout_ref, bout_ref, out_ref):
    x = x_ref[...]                                             # (TB, 9) f32

    # Fused stage 1: one MXU push computes both neighbor embeddings and the
    # state_loc contribution to layer2 (block-structured bf16 weight).
    s1 = jnp.dot(x.astype(jnp.bfloat16), wa_ref[...],
                 preferred_element_type=jnp.float32)           # (TB, 384) f32
    b1 = b1_ref[...]
    h0 = jnp.maximum(s1[:, 0:128] + b1, 0.0)                   # relu(layer1(n0))
    h1 = jnp.maximum(s1[:, 128:256] + b1, 0.0)                 # relu(layer1(n1))
    z2a = s1[:, 256:384]                                       # state_loc @ w2[:5]
    # vstack(even, odd) + mean(dim=0) + reshape(-1, 128)  ==  per-pair average
    mean_feature = 0.5 * (h0 + h1)                             # (TB, 128) f32

    # layer2: K=128 matmul on mean_feature + precomputed state_loc part.
    z2 = (jnp.dot(mean_feature.astype(jnp.bfloat16), w2b_ref[...],
                  preferred_element_type=jnp.float32)
          + z2a + b2_ref[...])
    h2 = jnp.maximum(z2, 0.0)                                  # (TB, 128) f32

    # Fused dueling hidden layers: [adv_h | val_h] in one (TB,128)@(128,128) dot.
    h34 = jnp.maximum(
        jnp.dot(h2.astype(jnp.bfloat16), w34_ref[...],
                preferred_element_type=jnp.float32) + b34_ref[...],
        0.0)                                                   # (TB, 128) f32

    # Fused output heads WITH the dueling combine folded into W_out/b_out:
    #   out = state_value + advantage - mean(advantage)  == h34 @ W_out + b_out
    out_ref[...] = (jnp.dot(h34.astype(jnp.bfloat16), wout_ref[...],
                            preferred_element_type=jnp.float32)
                    + bout_ref[...])                           # (TB, A) f32


def make_params(key):
    """PyTorch-style uniform(-1/sqrt(fan_in), +1/sqrt(fan_in)) init, deterministic."""
    def linear(k, fan_in, fan_out):
        kw, kb = jax.random.split(k)
        bound = 1.0 / float(fan_in) ** 0.5
        w = jax.random.uniform(kw, (fan_in, fan_out), jnp.float32, -bound, bound)
        b = jax.random.uniform(kb, (1, fan_out), jnp.float32, -bound, bound)
        return w, b

    ks = jax.random.split(key, 6)
    p = {}
    p["w1"], p["b1"] = linear(ks[0], 2, 128)
    p["w2"], p["b2"] = linear(ks[1], 128 + 5, 128)
    p["w3"], p["b3"] = linear(ks[2], 128, 64)
    p["w4"], p["b4"] = linear(ks[3], 128, 64)
    p["w5"], p["b5"] = linear(ks[4], 64, NUM_ACTION)
    p["w6"], p["b6"] = linear(ks[5], 64, 1)
    return p


def _round_up(n, m):
    return ((n + m - 1) // m) * m


def _fuse_params(params):
    """Build the block-structured fused weights (bf16) + biases (f32)."""
    A = NUM_ACTION
    w1 = params["w1"]                      # (2, 128)
    w2a = params["w2"][:5, :]              # (5, 128)   acts on state_loc
    w2b = params["w2"][5:, :]              # (128, 128) acts on mean_feature

    # W_a: (9, 384) -> [n0@w1 | n1@w1 | state_loc@w2a] from the raw (B, 9) input.
    wa = jnp.zeros((9, 384), jnp.float32)
    wa = wa.at[5:7, 0:128].set(w1)
    wa = wa.at[7:9, 128:256].set(w1)
    wa = wa.at[0:5, 256:384].set(w2a)

    # Fused dueling hidden layers: [w3 | w4] -> (128, 128), bias (1, 128).
    w34 = jnp.concatenate([params["w3"], params["w4"]], axis=1)
    b34 = jnp.concatenate([params["b3"], params["b4"]], axis=1)

    # Dueling combine folded into the output weight (exact algebra):
    #   advantage - mean(advantage)  == advantage @ (I - J/A)
    #   state_value broadcast        == state_value @ ones(1, A)
    centering = jnp.eye(A, dtype=jnp.float32) - jnp.full((A, A), 1.0 / A, jnp.float32)
    ones_row = jnp.ones((1, A), jnp.float32)
    w_out = jnp.concatenate([params["w5"] @ centering,
                             params["w6"] @ ones_row], axis=0)     # (128, A)
    b_out = params["b5"] @ centering + params["b6"] @ ones_row     # (1, A)

    bf16 = lambda w: w.astype(jnp.bfloat16)
    return (bf16(wa), params["b1"], bf16(w2b), params["b2"],
            bf16(w34), b34, bf16(w_out), b_out)


def net_forward(x, params, *, tb=2048):
    B = x.shape[0]
    A = NUM_ACTION

    # Batch tile: multiple of 8 sublanes, capped at `tb` (~11 MB live VMEM at
    # TB=2048 -> fits comfortably under v7x's 64 MiB).  Force an EVEN number of
    # grid steps (>=2) so dimension_semantics=("parallel",) shards the batch
    # across both TensorCores on v7x; harmless on single-TC v5e/v6e.
    TB = min(int(tb), max(8, _round_up(pl.cdiv(B, 2), 8)))
    Bp = _round_up(B, 2 * TB)
    if Bp != B:
        x = jnp.pad(x, ((0, Bp - B), (0, 0)))

    fused = _fuse_params(params)
    args = (x,) + fused

    grid = (Bp // TB,)
    weight_specs = [
        pl.BlockSpec(w.shape, lambda i: (0, 0))   # resident across the batch grid
        for w in fused
    ]

    out = pl.pallas_call(
        dueling_net_kernel,
        out_shape=jax.ShapeDtypeStruct((Bp, A), jnp.float32),
        grid=grid,
        in_specs=[pl.BlockSpec((TB, 9), lambda i: (i, 0))] + weight_specs,
        out_specs=pl.BlockSpec((TB, A), lambda i: (i, 0)),
        compiler_params=pltpu.CompilerParams(
            dimension_semantics=("parallel",),
            vmem_limit_bytes=48 * 1024 * 1024),
    )(*args)
    return out[:B]


def net_forward_ref(x, params):
    """Pure-JAX f32 reference mirroring the PyTorch forward exactly (validation)."""
    state_loc = x[:, :5]
    state_ij = x[:, 5:].reshape(-1, 2)                       # (2B, 2)
    h = jax.nn.relu(state_ij @ params["w1"] + params["b1"])  # (2B, 128)
    feature = jnp.stack([h[0::2, :].reshape(-1), h[1::2, :].reshape(-1)], axis=0)
    mean_feature = jnp.mean(feature, axis=0, keepdims=True).reshape(-1, 128)
    mean_feature = jnp.concatenate([state_loc, mean_feature], axis=1)  # (B, 133)
    h2 = jax.nn.relu(mean_feature @ params["w2"] + params["b2"])
    adv = jax.nn.relu(h2 @ params["w3"] + params["b3"]) @ params["w5"] + params["b5"]
    val = jax.nn.relu(h2 @ params["w4"] + params["b4"]) @ params["w6"] + params["b6"]
    return val + adv - jnp.mean(adv, axis=1, keepdims=True)


if __name__ == "__main__":
    key = jax.random.PRNGKey(0)
    kx, kp, kx2 = jax.random.split(key, 3)
    params = make_params(kp)

    # Small primary test (TB=8, padded to a 2-step grid).
    B = 8
    x = jax.random.normal(kx, (B, 9), dtype=jnp.float32)
    out = net_forward(x, params)
    jax.block_until_ready(out)
    ref = net_forward_ref(x, params)
    assert out.shape == (B, NUM_ACTION)
    # bf16 matmul operands (f32 accumulation) -> loosened tolerance per review.
    assert jnp.allclose(out, ref, atol=3e-2, rtol=3e-2)

    # Unaligned batch with a multi-step grid (exercises padding + pipelining path).
    B2 = 300
    x2 = jax.random.normal(kx2, (B2, 9), dtype=jnp.float32)
    out2 = net_forward(x2, params, tb=128)
    jax.block_until_ready(out2)
    ref2 = net_forward_ref(x2, params)
    assert out2.shape == (B2, NUM_ACTION)
    assert jnp.allclose(out2, ref2, atol=3e-2, rtol=3e-2)

    # TODO(synk): the PyTorch branch `if mean_feature.shape[0] != 0` (empty-neighbor
    # fallback) is a static shape check that never triggers for a fixed (B, 9) input;
    # it is not representable as data-dependent control flow in a fixed-shape kernel.
    print("KERNEL_OK")
</pallas_src>

<mosaic_0001>
module attributes {stable_mosaic.version = 11 : i64} {
  func.func @dueling_net_kernel(%arg0: i32, %arg1: memref<8x9xf32, #tpu.memory_space<vmem>>, %arg2: memref<9x384xbf16, #tpu.memory_space<vmem>>, %arg3: memref<1x128xf32, #tpu.memory_space<vmem>>, %arg4: memref<128x128xbf16, #tpu.memory_space<vmem>>, %arg5: memref<1x128xf32, #tpu.memory_space<vmem>>, %arg6: memref<128x128xbf16, #tpu.memory_space<vmem>>, %arg7: memref<1x128xf32, #tpu.memory_space<vmem>>, %arg8: memref<128x8xbf16, #tpu.memory_space<vmem>>, %arg9: memref<1x8xf32, #tpu.memory_space<vmem>>, %arg10: memref<8x8xf32, #tpu.memory_space<vmem>>) attributes {dimension_semantics = [#tpu.dimension_semantics<parallel>], iteration_bounds = array<i64: 2>, scalar_prefetch = 0 : i64, scratch_operands = 0 : i64, tpu.core_type = #tpu.core_type<tc>, window_params = [{transform_indices = @transform_0, window_bounds = array<i64: 8, 9>}, {pipeline_mode = #tpu.pipeline_mode<synchronous>, transform_indices = @transform_1, window_bounds = array<i64: 9, 384>}, {pipeline_mode = #tpu.pipeline_mode<synchronous>, transform_indices = @transform_2, window_bounds = array<i64: 1, 128>}, {pipeline_mode = #tpu.pipeline_mode<synchronous>, transform_indices = @transform_3, window_bounds = array<i64: 128, 128>}, {pipeline_mode = #tpu.pipeline_mode<synchronous>, transform_indices = @transform_4, window_bounds = array<i64: 1, 128>}, {pipeline_mode = #tpu.pipeline_mode<synchronous>, transform_indices = @transform_5, window_bounds = array<i64: 128, 128>}, {pipeline_mode = #tpu.pipeline_mode<synchronous>, transform_indices = @transform_6, window_bounds = array<i64: 1, 128>}, {pipeline_mode = #tpu.pipeline_mode<synchronous>, transform_indices = @transform_7, window_bounds = array<i64: 128, 8>}, {pipeline_mode = #tpu.pipeline_mode<synchronous>, transform_indices = @transform_8, window_bounds = array<i64: 1, 8>}, {transform_indices = @transform_9, window_bounds = array<i64: 8, 8>}]} {
    %c0 = arith.constant 0 : index
    %c0_0 = arith.constant 0 : index
    %0 = vector.load %arg1[%c0, %c0_0] : memref<8x9xf32, #tpu.memory_space<vmem>>, vector<8x9xf32>
    %1 = arith.truncf %0 : vector<8x9xf32> to vector<8x9xbf16>
    %c0_1 = arith.constant 0 : index
    %c0_2 = arith.constant 0 : index
    %2 = vector.load %arg2[%c0_1, %c0_2] : memref<9x384xbf16, #tpu.memory_space<vmem>>, vector<9x384xbf16>
    %cst = arith.constant dense<0.000000e+00> : vector<8x384xf32>
    %3 = tpu.matmul %1, %2, %cst {dimension_numbers = #tpu.dot_dimension_numbers<[1], [0], [0], [1], [0, 0, 1, 1], [], []>} : vector<8x9xbf16>, vector<9x384xbf16>, vector<8x384xf32> -> vector<8x384xf32>
    %c0_3 = arith.constant 0 : index
    %c0_4 = arith.constant 0 : index
    %4 = vector.load %arg3[%c0_3, %c0_4] : memref<1x128xf32, #tpu.memory_space<vmem>>, vector<1x128xf32>
    %5 = vector.extract_strided_slice %3 {offsets = [0, 0], sizes = [8, 128], strides = [1, 1]} : vector<8x384xf32> to vector<8x128xf32>
    %6 = vector.broadcast %4 : vector<1x128xf32> to vector<8x128xf32>
    %7 = arith.addf %5, %6 : vector<8x128xf32>
    %cst_5 = arith.constant 0.000000e+00 : f32
    %8 = vector.broadcast %cst_5 : f32 to vector<8x128xf32>
    %9 = arith.maximumf %7, %8 : vector<8x128xf32>
    %10 = vector.extract_strided_slice %3 {offsets = [0, 128], sizes = [8, 128], strides = [1, 1]} : vector<8x384xf32> to vector<8x128xf32>
    %11 = vector.broadcast %4 : vector<1x128xf32> to vector<8x128xf32>
    %12 = arith.addf %10, %11 : vector<8x128xf32>
    %cst_6 = arith.constant 0.000000e+00 : f32
    %13 = vector.broadcast %cst_6 : f32 to vector<8x128xf32>
    %14 = arith.maximumf %12, %13 : vector<8x128xf32>
    %15 = vector.extract_strided_slice %3 {offsets = [0, 256], sizes = [8, 128], strides = [1, 1]} : vector<8x384xf32> to vector<8x128xf32>
    %16 = arith.addf %9, %14 : vector<8x128xf32>
    %cst_7 = arith.constant 5.000000e-01 : f32
    %17 = vector.broadcast %cst_7 : f32 to vector<8x128xf32>
    %18 = arith.mulf %17, %16 : vector<8x128xf32>
    %19 = arith.truncf %18 : vector<8x128xf32> to vector<8x128xbf16>
    %c0_8 = arith.constant 0 : index
    %c0_9 = arith.constant 0 : index
    %20 = vector.load %arg4[%c0_8, %c0_9] : memref<128x128xbf16, #tpu.memory_space<vmem>>, vector<128x128xbf16>
    %cst_10 = arith.constant dense<0.000000e+00> : vector<8x128xf32>
    %21 = tpu.matmul %19, %20, %cst_10 {dimension_numbers = #tpu.dot_dimension_numbers<[1], [0], [0], [1], [0, 0, 1, 1], [], []>} : vector<8x128xbf16>, vector<128x128xbf16>, vector<8x128xf32> -> vector<8x128xf32>
    %22 = arith.addf %21, %15 : vector<8x128xf32>
    %c0_11 = arith.constant 0 : index
    %c0_12 = arith.constant 0 : index
    %23 = vector.load %arg5[%c0_11, %c0_12] : memref<1x128xf32, #tpu.memory_space<vmem>>, vector<1x128xf32>
    %24 = vector.broadcast %23 : vector<1x128xf32> to vector<8x128xf32>
    %25 = arith.addf %22, %24 : vector<8x128xf32>
    %cst_13 = arith.constant 0.000000e+00 : f32
    %26 = vector.broadcast %cst_13 : f32 to vector<8x128xf32>
    %27 = arith.maximumf %25, %26 : vector<8x128xf32>
    %28 = arith.truncf %27 : vector<8x128xf32> to vector<8x128xbf16>
    %c0_14 = arith.constant 0 : index
    %c0_15 = arith.constant 0 : index
    %29 = vector.load %arg6[%c0_14, %c0_15] : memref<128x128xbf16, #tpu.memory_space<vmem>>, vector<128x128xbf16>
    %cst_16 = arith.constant dense<0.000000e+00> : vector<8x128xf32>
    %30 = tpu.matmul %28, %29, %cst_16 {dimension_numbers = #tpu.dot_dimension_numbers<[1], [0], [0], [1], [0, 0, 1, 1], [], []>} : vector<8x128xbf16>, vector<128x128xbf16>, vector<8x128xf32> -> vector<8x128xf32>
    %c0_17 = arith.constant 0 : index
    %c0_18 = arith.constant 0 : index
    %31 = vector.load %arg7[%c0_17, %c0_18] : memref<1x128xf32, #tpu.memory_space<vmem>>, vector<1x128xf32>
    %32 = vector.broadcast %31 : vector<1x128xf32> to vector<8x128xf32>
    %33 = arith.addf %30, %32 : vector<8x128xf32>
    %cst_19 = arith.constant 0.000000e+00 : f32
    %34 = vector.broadcast %cst_19 : f32 to vector<8x128xf32>
    %35 = arith.maximumf %33, %34 : vector<8x128xf32>
    %36 = arith.truncf %35 : vector<8x128xf32> to vector<8x128xbf16>
    %c0_20 = arith.constant 0 : index
    %c0_21 = arith.constant 0 : index
    %37 = vector.load %arg8[%c0_20, %c0_21] : memref<128x8xbf16, #tpu.memory_space<vmem>>, vector<128x8xbf16>
    %cst_22 = arith.constant dense<0.000000e+00> : vector<8x8xf32>
    %38 = tpu.matmul %36, %37, %cst_22 {dimension_numbers = #tpu.dot_dimension_numbers<[1], [0], [0], [1], [0, 0, 1, 1], [], []>} : vector<8x128xbf16>, vector<128x8xbf16>, vector<8x8xf32> -> vector<8x8xf32>
    %c0_23 = arith.constant 0 : index
    %c0_24 = arith.constant 0 : index
    %39 = vector.load %arg9[%c0_23, %c0_24] : memref<1x8xf32, #tpu.memory_space<vmem>>, vector<1x8xf32>
    %40 = vector.broadcast %39 : vector<1x8xf32> to vector<8x8xf32>
    %41 = arith.addf %38, %40 : vector<8x8xf32>
    %c0_25 = arith.constant 0 : index
    %c0_26 = arith.constant 0 : index
    %42 = vector.load %arg10[%c0_25, %c0_26] : memref<8x8xf32, #tpu.memory_space<vmem>>, vector<8x8xf32>
    tpu.vector_store %arg10[%c0_25, %c0_26], %41 {strides = array<i32>} : memref<8x8xf32, #tpu.memory_space<vmem>>, vector<8x8xf32>,
    return
  }
  func.func @transform_0(%arg0: i32) -> (i32, i32) {
    %c0_i32 = arith.constant 0 : i32
    %c0_i32_0 = arith.constant 0 : i32
    return %arg0, %c0_i32 : i32, i32
  }
  func.func @transform_1(%arg0: i32) -> (i32, i32) {
    %c0_i32 = arith.constant 0 : i32
    %c0_i32_0 = arith.constant 0 : i32
    %c0_i32_1 = arith.constant 0 : i32
    return %c0_i32, %c0_i32_0 : i32, i32
  }
  func.func @transform_2(%arg0: i32) -> (i32, i32) {
    %c0_i32 = arith.constant 0 : i32
    %c0_i32_0 = arith.constant 0 : i32
    %c0_i32_1 = arith.constant 0 : i32
    return %c0_i32, %c0_i32_0 : i32, i32
  }
  func.func @transform_3(%arg0: i32) -> (i32, i32) {
    %c0_i32 = arith.constant 0 : i32
    %c0_i32_0 = arith.constant 0 : i32
    %c0_i32_1 = arith.constant 0 : i32
    return %c0_i32, %c0_i32_0 : i32, i32
  }
  func.func @transform_4(%arg0: i32) -> (i32, i32) {
    %c0_i32 = arith.constant 0 : i32
    %c0_i32_0 = arith.constant 0 : i32
    %c0_i32_1 = arith.constant 0 : i32
    return %c0_i32, %c0_i32_0 : i32, i32
  }
  func.func @transform_5(%arg0: i32) -> (i32, i32) {
    %c0_i32 = arith.constant 0 : i32
    %c0_i32_0 = arith.constant 0 : i32
    %c0_i32_1 = arith.constant 0 : i32
    return %c0_i32, %c0_i32_0 : i32, i32
  }
  func.func @transform_6(%arg0: i32) -> (i32, i32) {
    %c0_i32 = arith.constant 0 : i32
    %c0_i32_0 = arith.constant 0 : i32
    %c0_i32_1 = arith.constant 0 : i32
    return %c0_i32, %c0_i32_0 : i32, i32
  }
  func.func @transform_7(%arg0: i32) -> (i32, i32) {
    %c0_i32 = arith.constant 0 : i32
    %c0_i32_0 = arith.constant 0 : i32
    %c0_i32_1 = arith.constant 0 : i32
    return %c0_i32, %c0_i32_0 : i32, i32
  }
  func.func @transform_8(%arg0: i32) -> (i32, i32) {
    %c0_i32 = arith.constant 0 : i32
    %c0_i32_0 = arith.constant 0 : i32
    %c0_i32_1 = arith.constant 0 : i32
    return %c0_i32, %c0_i32_0 : i32, i32
  }
  func.func @transform_9(%arg0: i32) -> (i32, i32) {
    %c0_i32 = arith.constant 0 : i32
    %c0_i32_0 = arith.constant 0 : i32
    return %arg0, %c0_i32 : i32, i32
  }
}

</mosaic_0001>

<bundles_post_ra>
// kernel: tpu_custom_call.1
= control target key start
LH: loop header
LB: loop body
LE: loop exit
PB: predicated region body
PF: predicated region fallthrough
CT: control target
= control target key end

     0   :  { %14 = vsyncpa [#allocation3], 0  ;;  %s1625_s0 = inlined_call_operand.hbm [shape: f32[16,9], index: 0, kind: input, shape index: {}]   ;;  %s1626_s1 = inlined_call_operand.hbm [shape: bf16[9,384], index: 1, kind: input, shape index: {}]   ;;  %s1627_s2 = inlined_call_operand.vmem [shape: f32[1,128], index: 2, kind: input, shape index: {}]   ;;  %s1628_s3 = inlined_call_operand.vmem [shape: bf16[128,128], index: 3, kind: input, shape index: {}]   ;;  %s1629_s4 = inlined_call_operand.vmem [shape: f32[1,128], index: 4, kind: input, shape index: {}]   ;;  %s1630_s5 = inlined_call_operand.hbm [shape: bf16[128,128], index: 5, kind: input, shape index: {}]   ;;  %s1631_s6 = inlined_call_operand.vmem [shape: f32[1,128], index: 6, kind: input, shape index: {}]   ;;  %s1632_s7 = inlined_call_operand.vmem [shape: bf16[128,8], index: 7, kind: input, shape index: {}]   ;;  %s1633_s8 = inlined_call_operand.vmem [shape: f32[1,8], index: 8, kind: input, shape index: {}]   ;;  %s1634_s9 = inlined_call_operand.vmem [shape: f32[16,8], index: 9, kind: output, shape index: {}]  }
   0x1   :  { %16 = vsyncpa [#allocation3 + $0x1], 0 }
   0x2   :  { %17 = vsyncpa [#allocation5], 0  ;;  %s1358_s30 = smov 0   ;;  %s1360_s10 = smov 0  }
   0x3   :  { %s1362_s11 = smov 0   ;;  %s1364_s12 = smov 0  }
   0x4 LB: > { %s1377_s13 = sadd.s32 4294967295, %s1295_s12   ;;  %p43_p0 = scmp.ne.s32.totalorder %s1287_s10, %s1283_s30  ;;  %s1295_s12 = sphi %s1364_s12, %s1649_s12   ;;  %s1291_s11 = sphi %s1362_s11, %s1648_s11   ;;  %s1287_s10 = sphi %s1360_s10, %s1647_s10   ;;  %s1283_s30 = sphi %s1358_s30, %s1646_s30  }
   0x5   : > { %p1635_p1 = scmp.eq.s32.totalorder %s1377_s13, 0  ;;  %p934_p2 = scmp.ge.s32.totalorder %s1295_s12, 1 }
   0x6   : > { %p248_p3 = scmp.lt.s32.totalorder %s1295_s12, 3  ;;  %s1297_s16 = smov [#allocation4]  }
   0x7   : > { %p1385_p4 = por %p1635_p1, %p43_p0  ;;  %s260_s17 = sshll.u32 %s1297_s16, 4  ;;  %s261_s17 = int_to_ptr.vmem [resolvable:$true] %s260_s17 }
   0x8   : > { %p1389_p5 = pnand %p934_p2, %p248_p3  ;;  %s1298_s19 = smov [#allocation6]  }
   0x9   : > { %s1638_s14 = scalar_select %p1385_p4, 1, 0 }
   0xa   : > { %s1639_s15 = scalar_select %p1389_p5, 1, 0 }
   0xb   : > { %p1085_p6 = pneg %p1389_p5  ;;  %s282_s20 = sshll.u32 %s1298_s19, 4  ;;  %s1401_s20 = int_to_ptr.vmem [resolvable:$true] %s282_s20 }
   0xc   : > { %s1171_s23 = scalar_lea.hbm %s1626_s1, 384 }
   0xd   : > { %p1397_p7 = pnand %p1085_p6, %p1635_p1  ;;  %p1172_p8 = scmp.ne.s32.totalorder %s1626_s1, %s1171_s23 }
   0xe   : > { %p1178_p12 = scmp.lt.u32.totalorder %s1171_s23, %s1626_s1 }
   0xf   : > { %p1173_p9 = pneg %p1397_p7 }
  0x11   : > { %p1174_p10 = pnand %p1173_p9, %p1172_p8 }
  0x13   : > { %p1175_p11 = pneg %p1174_p10 }
  0x15   : > { %p1180_p13 = pnand %p1178_p12, %p1175_p11 }
  0x17   : > { %1183 = shalt.err (!%p1180_p13)
}
  0x18   : > { %s1184_s28 = scalar_lea.vmem %s261_s17, 384  ;;  %p1192_p6 = scmp.lt.s32.totalorder %s261_s17, %s261_s17 }
  0x19   : > { %p1185_p0 = scmp.ne.s32.totalorder %s261_s17, %s1184_s28  ;;  %p1193_p1 = scmp.lt.s32.totalorder %s1184_s28, %s1184_s28 }
  0x1b   : > { %p1187_p2 = pnand %p1185_p0, %p1173_p9  ;;  %p1194_p4 = por %p1193_p1, %p1192_p6 }
  0x1d   : > { %p1188_p3 = pneg %p1187_p2 }
  0x1f   : > { %p1195_p5 = pnand %p1194_p4, %p1188_p3 }
  0x21   : > { %1198 = shalt.err (!%p1195_p5)
}
  0x22   : > { %s1299_s29 = smov 192   ;;  %s1300_s30 = smov 12  }
  0x23   : > { %1088 = dma.hbm_to_vmem [thread:$0]  (!%p1397_p7), %s1626_s1, 384, %s261_s17, [#allocation5], %s1299_s29, %s1299_s29, %s1300_s30  }
  0x24   : > { %s1199_s23 = scalar_lea.hbm %s1630_s5, 1024 }
  0x25   : > { %p1200_p8 = scmp.ne.s32.totalorder %s1630_s5, %s1199_s23  ;;  %p1206_p5 = scmp.lt.u32.totalorder %s1199_s23, %s1630_s5 }
  0x27   : > { %p1202_p1 = pnand %p1200_p8, %p1173_p9 }
  0x29   : > { %p1203_p4 = pneg %p1202_p1 }
  0x2b   : > { %p1208_p10 = pnand %p1206_p5, %p1203_p4 }
  0x2d   : > { %1211 = shalt.err (!%p1208_p10)
}
  0x2e   : > { %s1212_s17 = scalar_lea.vmem %s1401_s20, 1024  ;;  %p1220_p0 = scmp.lt.s32.totalorder %s1401_s20, %s1401_s20 }
  0x2f   : > { %p1213_p11 = scmp.ne.s32.totalorder %s1401_s20, %s1212_s17  ;;  %p1221_p2 = scmp.lt.s32.totalorder %s1212_s17, %s1212_s17 }
  0x31   : > { %p1215_p12 = pnand %p1213_p11, %p1173_p9  ;;  %p1222_p3 = por %p1221_p2, %p1220_p0 }
  0x33   : > { %p1216_p13 = pneg %p1215_p12 }
  0x35   : > { %p1223_p6 = pnand %p1222_p3, %p1216_p13 }
  0x37   : > { %1226 = shalt.err (!%p1223_p6)
}
  0x38   : > { %s1301_s28 = smov 64   ;;  %s1302_s29 = smov 4  }
  0x39   : > { %1091 = dma.hbm_to_vmem [thread:$0]  (!%p1397_p7), %s1630_s5, 1024, %s1401_s20, [#allocation5], %s1301_s28, %s1301_s28, %s1302_s29  }
  0x3a   : > { %s1451_s19 = sadd.s32 1, %s1295_s12   ;;  %s30_s22 = sadd.s32 1, %s1291_s11 }
  0x3b   : > { %s27_s21 = ssub.s32 %s1295_s12, %s1451_s19  ;;  %p37_p8 = scmp.ne.s32.totalorder %s1291_s11, %s1287_s10 }
  0x3c   : > { %p28_p9 = scmp.eq.s32.totalorder %s27_s21, 0  ;;  %p38_p1 = scmp.eq.s32.totalorder %s1295_s12, 0 }
  0x3d   : > { %p1098_p5 = scmp.lt.s32.totalorder %s1295_s12, 2  ;;  %s305_s24 = sand.u32 1, %s1291_s11  }
  0x3e   : > { %s1460_s23 = scalar_select %p28_p9, %s1291_s11, %s30_s22  }
  0x3f   : > { %p39_p4 = por %p38_p1, %p37_p8  ;;  %s939_s25 = sshll.u32 %s1295_s12, 7 }
  0x40   : > { %s938_s26 = sshll.u32 %s305_s24, 3  ;;  %s1468_s17 = scalar_lea.hbm %s1625_s0, %s939_s25 }
  0x41   : > { %s309_s20 = scalar_lea.vmem [#allocation2], %s938_s26  ;;  %p1470_p7 = pnand %p1098_p5, %p39_p4 }
  0x42   : > { %s316_s28 = sshll.u32 %s309_s20, 4  ;;  %s306_s12 = scalar_lea.sflag [#allocation3], %s305_s24  ;;  %s1474_s28 = int_to_ptr.vmem [resolvable:$true] %s316_s28 }
  0x43   : > { %s1227_s30 = scalar_lea.hbm %s1468_s17, 128  ;;  %p1229_p11 = pneg %p1470_p7 }
  0x44   : > { %p1228_p10 = scmp.ne.s32.totalorder %s1468_s17, %s1227_s30  ;;  %s1232_s22 = scalar_lea.hbm %s1625_s0, 256 }
  0x45   : > { %p1233_p0 = scmp.lt.u32.totalorder %s1468_s17, %s1625_s0  ;;  %p1234_p2 = scmp.lt.u32.totalorder %s1232_s22, %s1227_s30 }
  0x46   : > { %p1230_p12 = pnand %p1229_p11, %p1228_p10  ;;  %p1236_p6 = scmp.lt.u32.totalorder %s1227_s30, %s1468_s17 }
  0x47   : > { %p1235_p3 = por %p1234_p2, %p1233_p0 }
  0x48   : > { %p1231_p13 = pneg %p1230_p12 }
  0x49   : > { %p1237_p9 = por %p1236_p6, %p1235_p3 }
  0x4b   : > { %p1238_p8 = pnand %p1237_p9, %p1231_p13 }
  0x4d   : > { %1241 = shalt.err (!%p1238_p8)
}
  0x4e   : > { %s1242_s24 = scalar_lea.vmem %s1474_s28, 128  ;;  %s1303_s18 = smov [#allocation2]  }
  0x4f   : > { %p1243_p1 = scmp.ne.s32.totalorder %s1474_s28, %s1242_s24  ;;  %s1247_s27 = sshll.u32 %s1303_s18, 4  ;;  %s1248_s27 = int_to_ptr.vmem [resolvable:$false] %s1247_s27 }
  0x50   : > { %s1249_s20 = scalar_lea.vmem %s1248_s27, 256  ;;  %p1250_p10 = scmp.lt.s32.totalorder %s1474_s28, %s1248_s27 }
  0x51   : > { %p1245_p4 = pnand %p1243_p1, %p1229_p11  ;;  %p1251_p12 = scmp.lt.s32.totalorder %s1249_s20, %s1242_s24 }
  0x53   : > { %p1246_p5 = pneg %p1245_p4  ;;  %p1252_p0 = por %p1251_p12, %p1250_p10 }
  0x55   : > { %p1253_p2 = pnand %p1252_p0, %p1246_p5 }
  0x57   : > { %1256 = shalt.err (!%p1253_p2)
}
  0x58   : > { %1095 = dma.hbm_to_vmem [thread:$0]  (!%p1470_p7), %s1468_s17, 128, %s1474_s28, %s306_s12  }
  0x59   : > { %p1642_p13 = scmp.ne.s32.totalorder %s1639_s15, 0 }
  0x5a   : > { %s327_s30 = sand.u32 (!%p1642_p13), 1, %s1287_s10   ;;  %p1643_p11 = scmp.ne.s32.totalorder (!%p1642_p13), %s1638_s14, 0 }
  0x5b   : > { %325 = sbr.rel (%p1642_p13) target bundleno = 988 (0x3dc), region = 56  ;;  %s941_s16 = sshll.u32 (!%p1642_p13), %s327_s30, 3 }
  0x5c   : > { %s328_s21 = scalar_lea.sflag (!%p1642_p13), [#allocation3], %s327_s30  ;;  %s331_s22 = scalar_lea.vmem (!%p1642_p13), [#allocation2], %s941_s16 }
  0x62   : > { %1274 = dma.done.wait (%p1643_p11), %s328_s21, 128  }
  0x63   : > { %1276 = vsyncadd (%p1643_p11), %s328_s21, 4294967168  ;;  %p1644_p3 = scmp.eq.s32.totalorder %s1377_s13, 0 }
  0x65   : > { %1278 = dma.done.wait (%p1644_p3), [#allocation5], 1408   ;;  %p1645_p6 = pmov %p1644_p3 }
  0x66   : > { %vm401_vm0 = vcmask 1043456   ;;  %v1304_v0 = vmov 0   ;;  %v1305_v1 = vmov 0.0   ;;  %vm402_vm1 = vcmask 1044480   ;;  %v378_v6 = vld [vmem:[%s331_s22] sm:$0xff]  ;;  %v1149_v15 = vld [vmem:[%s1628_s3 + $0x10] sm:$0xff]  }
  0x67   : > { %1280 = vsyncadd (%p1645_p6), [#allocation5], 4294965888  ;;  %446 = vmatprep.mubr.bf16.mxu1 %v1304_v0  ;;  %1015 = vmatprep.subr.bf16.mxu0 %v1305_v1  ;;  %v1306_v2 = vmov 65535   ;;  %v1143_v5 = vld [vmem:[#allocation4 + $0x4] ss:$12 sps:$4 sm:$0x1f]   ;;  %v379_v12 = vpack.c.bf16 %v378_v6, %v378_v6 }
  0x68   : > { %v403_v3 = vsel %vm401_vm0, 4294967295, %v1306_v2  ;;  %v1145_v7 = vld [vmem:[#allocation4 + $0x8] ss:$12 sps:$4 sm:$0x1f]   ;;  %v1148_v13 = vld [vmem:[%s1628_s3 + $0x8] sm:$0xff]   ;;  %vm397_vm2 = vcmask 72704  }
  0x69   : > { %v404_v4 = vsel %vm402_vm1, %v403_v3, 0  ;;  %v1146_v8 = vld [vmem:[#allocation4] ss:$12 sps:$4 sm:$0x1f]   ;;  %v1147_v10 = vld [vmem:[%s1628_s3] sm:$0xff]   ;;  %v1152_v18 = vld [vmem:[%s1628_s3 + $0x28] sm:$0xff]  }
  0x6a   : > { %v409_v9 = vand.u32 %v1143_v5, %v404_v4  ;;  %v406_v11 = vand.u32 %v1146_v8, %v404_v4  ;;  %1016 = vmatpush3.bf16.msra.mxu0 %v1147_v10  ;;  %v412_v14 = vand.u32 %v1145_v7, %v404_v4  ;;  %v1150_v16 = vld [vmem:[%s1628_s3 + $0x18] sm:$0xff]   ;;  %v1151_v17 = vld [vmem:[%s1628_s3 + $0x20] sm:$0xff]   ;;  %v1153_v19 = vld [vmem:[%s1628_s3 + $0x30] sm:$0xff]   ;;  %vm1307_vm3 = vmmov 0   ;;  %p373_p7 = scmp.lt.s32.totalorder %s1377_s13, 1 }
  0x6b   : > { %1017 = vmatprep.subr.bf16.mxu0 %v1305_v1  ;;  %v1154_v20 = vld [vmem:[%s1628_s3 + $0x38] sm:$0xff]   ;;  %1031 = vmatprep.mubr.msk.bf16.mxu0 %vm1307_vm3, %v1305_v1  ;;  %v1155_v21 = vld [vmem:[#allocation6] sm:$0xff]   ;;  %v1156_v22 = vld [vmem:[#allocation6 + $0x8] sm:$0xff]   ;;  %vm847_vm4 = vcmask 64512  }
  0x6c   : > { %414 = vmatprep.subr.bf16.mxu1 %v409_v9  ;;  %v1157_v23 = vld [vmem:[#allocation6 + $0x10] sm:$0xff]   ;;  %v1158_v24 = vld [vmem:[#allocation6 + $0x18] sm:$0xff]   ;;  %v1159_v25 = vld [vmem:[#allocation6 + $0x20] sm:$0xff]   ;;  %s1651_s13 = smov (!%p373_p7, %s1377_s13), 1 }
  0x6d   : > { %415 = vmatpush1.bf16.msra.mxu1 %v406_v11  ;;  %v1160_v26 = vld [vmem:[#allocation6 + $0x28] sm:$0xff]   ;;  %v950_v27 = vld [vmem:[%s1627_s2] ss:$0 sm:$0xff]  ;;  %v1161_v43 = vld [vmem:[#allocation6 + $0x30] sm:$0xff]   ;;  %s944_s25 = sshll.u32 %s1651_s13, 3 }
  0x6e   : > { %1009 = vmatprep.subr.bf16.mxu1 %v1305_v1  ;;  %1018 = vmatpush3.bf16.msra.mxu0 %v1148_v13  ;;  %v1162_v44 = vld [vmem:[#allocation6 + $0x38] sm:$0xff]   ;;  %v1164_v46 = vld [vmem:[%s1632_s7 + $0x8] sm:$0xff]   ;;  %v1165_v47 = vld [vmem:[%s1632_s7 + $0x10] sm:$0xff]   ;;  %s376_s20 = scalar_lea.vmem %s1634_s9, %s944_s25 }
  0x6f   : > { %1019 = vmatprep.subr.bf16.mxu0 %v1305_v1  ;;  %v1163_v45 = vld [vmem:[%s1632_s7] sm:$0xff]   ;;  %v1166_v48 = vld [vmem:[%s1632_s7 + $0x18] sm:$0xff]   ;;  %v1168_v50 = vld [vmem:[%s1632_s7 + $0x28] sm:$0xff]  }
  0x70   : > { %948 = vmatmul.mubr.msk.bf16.vlgmr.msra.gmra.mrb[0].mxu1 %vm397_vm2, %v379_v12  ;;  %v1167_v49 = vld [vmem:[%s1632_s7 + $0x20] sm:$0xff]   ;;  %v1169_v60 = vld [vmem:[%s1632_s7 + $0x30] sm:$0xff]   ;;  %v1170_v61 = vld [vmem:[%s1632_s7 + $0x38] sm:$0xff]  }
  0x71   : > { %1010 = vmatpush3.bf16.msra.mxu1 %v412_v14  ;;  %1011 = vmatprep.mubr.msk.bf16.mxu1 %vm1307_vm3, %v1305_v1  ;;  %v959_v52 = vld [vmem:[%s1629_s4] ss:$0 sm:$0xff] }
  0x72   : > { %1035 = vmatprep.subr.bf16.mxu1 %v1305_v1  ;;  %1020 = vmatpush3.bf16.msra.mxu0 %v1149_v15  ;;  %v960_v62 = vld [vmem:[%s1631_s6] ss:$0 sm:$0xff] }
  0x73   : > { %1021 = vmatprep.subr.bf16.mxu0 %v1305_v1 }
  0x76   : > { %1022 = vmatpush3.bf16.msra.mxu0 %v1150_v16 }
  0x77   : > { %1023 = vmatprep.subr.bf16.mxu0 %v1305_v1 }
  0x78   : > { %1012 = vmatmul.mubr.msk.bf16.vlgmr.msra.gmra.mrb[4].mxu1 %vm397_vm2, %v379_v12 }
  0x79   : > { %1051 = vmatprep.mubr.msk.bf16.mxu1 %vm1307_vm3, %v1305_v1  ;;  %1036 = vmatpush3.bf16.msra.mxu1 %v1155_v21 }
  0x7a   : > { %1024 = vmatpush3.bf16.msra.mxu0 %v1151_v17  ;;  %1037 = vmatprep.subr.bf16.mxu1 %v1305_v1 }
  0x7b   : > { %1025 = vmatprep.subr.bf16.mxu0 %v1305_v1 }
  0x7d   : > { %1038 = vmatpush3.bf16.msra.mxu1 %v1156_v22 }
  0x7e   : > { %1026 = vmatpush3.bf16.msra.mxu0 %v1152_v18  ;;  %1039 = vmatprep.subr.bf16.mxu1 %v1305_v1 }
  0x7f   : > { %1027 = vmatprep.subr.bf16.mxu0 %v1305_v1 }
  0x81   : > { %1040 = vmatpush3.bf16.msra.mxu1 %v1157_v23 }
  0x82   : > { %1028 = vmatpush3.bf16.msra.mxu0 %v1153_v19  ;;  %1041 = vmatprep.subr.bf16.mxu1 %v1305_v1 }
  0x83   : > { %1029 = vmatprep.subr.bf16.mxu0 %v1305_v1 }
  0x85   : > { %1042 = vmatpush3.bf16.msra.mxu1 %v1158_v24 }
  0x86   : > { %1030 = vmatpush3.bf16.msra.mxu0 %v1154_v20  ;;  %1043 = vmatprep.subr.bf16.mxu1 %v1305_v1 }
  0x87   : > { %1055 = vmatprep.subr.bf16.mxu0 %v1305_v1 }
  0x89   : > { %1044 = vmatpush3.bf16.msra.mxu1 %v1159_v25 }
  0x8a   : > { %1045 = vmatprep.subr.bf16.mxu1 %v1305_v1 }
  0x8d   : > { %1046 = vmatpush3.bf16.msra.mxu1 %v1160_v26 }
  0x8e   : > { %1047 = vmatprep.subr.bf16.mxu1 %v1305_v1 }
  0x91   : > { %1048 = vmatpush3.bf16.msra.mxu1 %v1161_v43 }
  0x92   : > { %1049 = vmatprep.subr.bf16.mxu1 %v1305_v1 }
  0x95   : > { %1050 = vmatpush3.bf16.msra.mxu1 %v1162_v44 }
 0x143   : > { %v448_v28 = vpop.f32.mrb[0].mxu1 }
 0x144   : > { %v502_v29 = vadd.f32 %v950_v27, %v448_v28  ;;  %v450_v30 = vpop.f32.mrb[1].mxu1 }
 0x145   : > { %v504_v31 = vadd.f32 %v950_v27, %v450_v30  ;;  %v452_v32 = vpop.f32.mrb[2].mxu1 }
 0x146   : > { %v503_v33 = vmax.f32 %v502_v29, 0.0  ;;  %v453_v34 = vpop.f32.mrb[3].mxu1 }
 0x147   : > { %v505_v35 = vmax.f32 %v504_v31, 0.0 }
 0x149   : > { %v506_v36 = vadd.f32 %v505_v35, %v503_v33 }
 0x14b   : > { %v507_v37 = vmul.f32 0.5, %v506_v36  ;;  %v489_v39 = vpop.f32.mrb[4].mxu1 }
 0x14c   : > { %v1013_v40 = vpop.f32.mrb[5].mxu1 }
 0x14d   : > { %v508_v38 = vpack.c.bf16 %v507_v37, %v507_v37  ;;  %v492_v41 = vpop.f32.mrb[6].mxu1 }
 0x14e   : > { %v1014_v42 = vpop.f32.mrb[7].mxu1 }
 0x14f   : > { %1032 = vmatmul.mubr.bf16.vlgmr.msra.gmra.mrb[0].mxu0 %v508_v38 }
 0x150   : > { %1071 = vmatprep.mubr.msk.bf16.mxu0 %vm1307_vm3, %v1305_v1  ;;  %1056 = vmatpush3.bf16.msra.mxu0 %v1163_v45 }
 0x151   : > { %1057 = vmatprep.subr.bf16.mxu0 %v1305_v1 }
 0x154   : > { %1058 = vmatpush3.bf16.msra.mxu0 %v1164_v46 }
 0x155   : > { %1059 = vmatprep.subr.bf16.mxu0 %v1305_v1 }
 0x158   : > { %1060 = vmatpush3.bf16.msra.mxu0 %v1165_v47 }
 0x159   : > { %1061 = vmatprep.subr.bf16.mxu0 %v1305_v1 }
 0x15c   : > { %1062 = vmatpush3.bf16.msra.mxu0 %v1166_v48 }
 0x15d   : > { %1063 = vmatprep.subr.bf16.mxu0 %v1305_v1 }
 0x160   : > { %1064 = vmatpush3.bf16.msra.mxu0 %v1167_v49 }
 0x161   : > { %1065 = vmatprep.subr.bf16.mxu0 %v1305_v1 }
 0x164   : > { %1066 = vmatpush3.bf16.msra.mxu0 %v1168_v50 }
 0x165   : > { %1067 = vmatprep.subr.bf16.mxu0 %v1305_v1 }
 0x168   : > { %1068 = vmatpush3.bf16.msra.mxu0 %v1169_v60 }
 0x169   : > { %1069 = vmatprep.subr.bf16.mxu0 %v1305_v1  ;;  %v969_v1 = vld [vmem:[%s1633_s8] ss:$0 sm:$0xff] }
 0x16c   : > { %1070 = vmatpush3.bf16.msra.mxu0 %v1170_v61 }
 0x222   : > { %v607_v51 = vpop.f32.mrb[0].mxu0 }
 0x223   : > { %v608_v53 = vadd.f32 %v607_v51, %v489_v39  ;;  %v1033_v54 = vpop.f32.mrb[1].mxu0 }
 0x224   : > { %v610_v55 = vpop.f32.mrb[2].mxu0 }
 0x225   : > { %v620_v56 = vadd.f32 %v959_v52, %v608_v53  ;;  %v1034_v57 = vpop.f32.mrb[3].mxu0 }
 0x227   : > { %v621_v58 = vmax.f32 %v620_v56, 0.0 }
 0x229   : > { %v622_v59 = vpack.c.bf16 %v621_v58, %v621_v58 }
 0x22b   : > { %1052 = vmatmul.mubr.bf16.vlgmr.msra.gmra.mrb[8].mxu1 %v622_v59 }
 0x2fe   : > { %v728_v63 = vpop.f32.mrb[8].mxu1 }
 0x2ff   : > { %v729_v0 = vadd.f32 %v960_v62, %v728_v63  ;;  %v1053_v2 = vpop.f32.mrb[9].mxu1 }
 0x300   : > { %v731_v3 = vpop.f32.mrb[10].mxu1 }
 0x301   : > { %v734_v4 = vmax.f32 %v729_v0, 0.0  ;;  %v1054_v5 = vpop.f32.mrb[11].mxu1 }
 0x303   : > { %v735_v6 = vpack.c.bf16 %v734_v4, %v734_v4 }
 0x305   : > { %1072 = vmatmul.mubr.bf16.vlgmr.msra.gmra.mrb[4].mxu0 %v735_v6 }
 0x3d8   : > { %v841_v7 = vpop.f32.mrb[4].mxu0 }
 0x3d9   : > { %v842_v8 = vadd.f32 %v969_v1, %v841_v7  ;;  %v1073_v9 = vpop.f32.mrb[5].mxu0 }
 0x3da   : > { %v844_v10 = vpop.f32.mrb[6].mxu0 }
 0x3db   : > { %848 = vst.msk [vmem:[%s376_s20] sm:$0xff] %vm847_vm4, %v842_v8  ;;  %v1074_v11 = vpop.f32.mrb[7].mxu0 }
 0x3dc PF: > { %p20_p9 = scmp.ge.s32.totalorder %s1451_s19, 4   ;;  %s1646_s30 = smov %s1287_s10 }
 0x3dd   : > { %s1647_s10 = smov %s1291_s11  ;;  %s1648_s11 = smov %s1460_s23 }
 0x3de   : > { %s1649_s12 = smov %s1451_s19  ;;  %22 = sbr.rel (!%p20_p9) target bundleno = 4 (0x4), region = 104 }
 0x3e5   :  { %868 = vsyncpa [#allocation3], 1 }
 0x3e6   :  { %870 = vsyncpa [#allocation3 + $0x1], 1 }
 0x3e7   :  { %871 = vsyncpa [#allocation5], 1 }

</bundles_post_ra>
